<compile_context>
chip_gen: v7x
topology: tpu7x:2x2x1
jax: 0.10.0
libtpu: 0.0.40
codegen_flags: <defaults>
</compile_context>

<pallas_src>
import jax
import jax.numpy as jnp
from jax.experimental import pallas as pl
from jax.experimental.pallas import tpu as pltpu


def _make_convblock_kernel(nb, C_out, K, HW, negative_slope, eps):
    def kernel(p_ref, w_ref, o_ref):
        # p_ref: (nb, K, HW)      bf16 im2col patches (HW on the lane axis)
        # w_ref: (C_out, K)       bf16 reshaped conv weight
        # o_ref: (nb, C_out, HW)  f32 normalized + activated output
        w = w_ref[...]
        for b in range(nb):  # nb is a small static constant
            # ---- convolution: single deep-K matmul, f32 accumulation on the MXU
            y = jnp.dot(w, p_ref[b], preferred_element_type=jnp.float32)  # (C_out, HW)
            # ---- InstanceNorm2d (affine=False, biased variance) over HW per channel
            mean = jnp.mean(y, axis=1, keepdims=True)                      # (C_out, 1)
            diff = y - mean
            var = jnp.mean(diff * diff, axis=1, keepdims=True)
            yn = diff * jax.lax.rsqrt(var + eps)
            # ---- LeakyReLU(0.2)
            o_ref[b] = jnp.where(yn >= 0, yn, negative_slope * yn).astype(o_ref.dtype)

    return kernel


def _im2col_nchw(x_nchw, KH, KW, padding, stride):
    """(N, C_in, H, W) -> (N, KH*KW*C_in, H_out*W_out), K ordered (kh, kw, c_in)."""
    N, C_in, H, W = x_nchw.shape
    H_out = (H + 2 * padding - KH) // stride + 1
    W_out = (W + 2 * padding - KW) // stride + 1
    x_pad = jnp.pad(x_nchw, ((0, 0), (0, 0), (padding, padding), (padding, padding)))
    taps = []
    for kh in range(KH):
        for kw in range(KW):
            t = x_pad[:, :,
                      kh:kh + stride * (H_out - 1) + 1:stride,
                      kw:kw + stride * (W_out - 1) + 1:stride]
            taps.append(t.reshape(N, C_in, H_out * W_out))
    return jnp.concatenate(taps, axis=1), H_out, W_out  # (N, K, HW)


def _pick_batch_block(N, per_image_bytes, budget=16 * 1024 * 1024):
    """Largest divisor of N whose double-buffered block fits the budget while
    keeping >=2 grid steps (so both v7x TensorCores get work) when N >= 2."""
    nb = 1
    for cand in range(1, N + 1):
        if N % cand:
            continue
        if 2 * cand * per_image_bytes > budget:
            break
        if N >= 2 and N // cand < 2:
            continue
        nb = cand
    return nb


def conv_block_forward(x_nchw, weight, bias=None, *, stride=1, padding=1,
                       eps=1e-5, negative_slope=0.2, nb=None):
    """ConvBlock forward (Conv2d -> InstanceNorm2d -> LeakyReLU(0.2)).

    x_nchw : (N, C_in, H, W) float32
    weight : (C_out, C_in, KH, KW)
    bias   : (C_out,)  -- accepted for API parity; mathematically cancelled by
             the affine=False InstanceNorm, so it is not used.
    returns: (N, C_out, H_out, W_out) float32
    """
    del bias  # no-op under mean-subtracting InstanceNorm
    N, C_in, H, W = x_nchw.shape
    C_out, _, KH, KW = weight.shape
    K = KH * KW * C_in

    # ---- wrapper-side glue: im2col + weight reshape, bf16 MXU operands.
    patches, H_out, W_out = _im2col_nchw(x_nchw, KH, KW, padding, stride)
    HW = H_out * W_out
    patches = patches.astype(jnp.bfloat16)                                   # (N, K, HW)
    w2d = jnp.transpose(weight, (0, 2, 3, 1)).reshape(C_out, K).astype(jnp.bfloat16)

    # ---- pick batch block + VMEM budget.
    per_image_bytes = K * HW * 2 + C_out * HW * 4
    if nb is None:
        nb = _pick_batch_block(N, per_image_bytes)
    assert N % nb == 0, (N, nb)
    grid = (N // nb,)

    block_bytes = nb * K * HW * 2 + C_out * K * 2 + nb * C_out * HW * 4
    vmem_limit = int(min(64 * 1024 * 1024, max(32 * 1024 * 1024, 4 * block_bytes)))

    kernel = _make_convblock_kernel(nb, C_out, K, HW, negative_slope, eps)

    out = pl.pallas_call(
        kernel,
        out_shape=jax.ShapeDtypeStruct((N, C_out, HW), x_nchw.dtype),
        grid_spec=pltpu.PrefetchScalarGridSpec(
            num_scalar_prefetch=0,
            grid=grid,
            in_specs=[
                pl.BlockSpec((nb, K, HW), lambda i: (i, 0, 0)),
                pl.BlockSpec((C_out, K), lambda i: (0, 0)),
            ],
            out_specs=pl.BlockSpec((nb, C_out, HW), lambda i: (i, 0, 0)),
        ),
        compiler_params=pltpu.CompilerParams(
            dimension_semantics=("parallel",),
            vmem_limit_bytes=vmem_limit,
        ),
    )(patches, w2d)

    # (N, C_out, HW) -> (N, C_out, H_out, W_out): already NCHW, just reshape.
    return out.reshape(N, C_out, H_out, W_out)


def _reference(x_nchw, weight, bias, *, stride=1, padding=1, eps=1e-5, slope=0.2):
    """Pure-JAX f32 reference matching the PyTorch ConvBlock."""
    y = jax.lax.conv_general_dilated(
        x_nchw, weight, window_strides=(stride, stride),
        padding=[(padding, padding), (padding, padding)],
        dimension_numbers=("NCHW", "OIHW", "NCHW"),
    ) + bias[None, :, None, None]
    mean = jnp.mean(y, axis=(2, 3), keepdims=True)
    var = jnp.mean((y - mean) ** 2, axis=(2, 3), keepdims=True)
    y = (y - mean) * jax.lax.rsqrt(var + eps)
    return jnp.where(y >= 0, y, slope * y)


if __name__ == "__main__":
    key = jax.random.PRNGKey(0)
    k_x, k_w, k_b = jax.random.split(key, 3)

    N, C_in, H, W = 2, 4, 16, 16
    C_out, KH, KW = 8, 3, 3

    x = jax.random.normal(k_x, (N, C_in, H, W), dtype=jnp.float32)
    fan_in = C_in * KH * KW
    bound = 1.0 / (fan_in ** 0.5)
    weight = jax.random.uniform(k_w, (C_out, C_in, KH, KW), jnp.float32, -bound, bound)
    bias = jax.random.uniform(k_b, (C_out,), jnp.float32, -bound, bound)

    out = conv_block_forward(x, weight, bias, stride=1, padding=1)
    out = jax.block_until_ready(out)

    ref = _reference(x, weight, bias, stride=1, padding=1)
    assert out.shape == (N, C_out, H, W), out.shape
    # bf16 MXU operands (f32 accumulation / norm) -> slightly looser tolerance.
    err = float(jnp.max(jnp.abs(out - ref)))
    assert jnp.allclose(out, ref, atol=3e-2, rtol=1e-2), err

    print("KERNEL_OK")
</pallas_src>

<mosaic_0001>
module attributes {stable_mosaic.version = 11 : i64} {
  func.func @kernel(%arg0: i32, %arg1: memref<1x36x256xbf16, #tpu.memory_space<vmem>>, %arg2: memref<8x36xbf16, #tpu.memory_space<vmem>>, %arg3: memref<1x8x256xf32, #tpu.memory_space<vmem>>) attributes {dimension_semantics = [#tpu.dimension_semantics<parallel>], iteration_bounds = array<i64: 2>, scalar_prefetch = 0 : i64, scratch_operands = 0 : i64, tpu.core_type = #tpu.core_type<tc>, window_params = [{transform_indices = @transform_0, window_bounds = array<i64: 1, 36, 256>}, {pipeline_mode = #tpu.pipeline_mode<synchronous>, transform_indices = @transform_1, window_bounds = array<i64: 8, 36>}, {transform_indices = @transform_2, window_bounds = array<i64: 1, 8, 256>}]} {
    %c0 = arith.constant 0 : index
    %c0_0 = arith.constant 0 : index
    %0 = vector.load %arg2[%c0, %c0_0] : memref<8x36xbf16, #tpu.memory_space<vmem>>, vector<8x36xbf16>
    %c0_1 = arith.constant 0 : index
    %c0_2 = arith.constant 0 : index
    %c0_3 = arith.constant 0 : index
    %1 = vector.load %arg1[%c0_1, %c0_2, %c0_3] : memref<1x36x256xbf16, #tpu.memory_space<vmem>>, vector<1x36x256xbf16>
    %2 = vector.shape_cast %1 : vector<1x36x256xbf16> to vector<36x256xbf16>
    %cst = arith.constant dense<0.000000e+00> : vector<8x256xf32>
    %3 = tpu.matmul %0, %2, %cst {dimension_numbers = #tpu.dot_dimension_numbers<[1], [0], [0], [1], [0, 0, 1, 1], [], []>} : vector<8x36xbf16>, vector<36x256xbf16>, vector<8x256xf32> -> vector<8x256xf32>
    %cst_4 = arith.constant dense<0.000000e+00> : vector<8xf32>
    %4 = vector.multi_reduction <add>, %3, %cst_4 [1] : vector<8x256xf32> to vector<8xf32>
    %5 = vector.shape_cast %4 : vector<8xf32> to vector<8x1xf32>
    %cst_5 = arith.constant 2.560000e+02 : f32
    %6 = vector.broadcast %cst_5 : f32 to vector<8x1xf32>
    %7 = arith.divf %5, %6 : vector<8x1xf32>
    %8 = vector.broadcast %7 : vector<8x1xf32> to vector<8x256xf32>
    %9 = arith.subf %3, %8 : vector<8x256xf32>
    %10 = arith.mulf %9, %9 : vector<8x256xf32>
    %cst_6 = arith.constant dense<0.000000e+00> : vector<8xf32>
    %11 = vector.multi_reduction <add>, %10, %cst_6 [1] : vector<8x256xf32> to vector<8xf32>
    %12 = vector.shape_cast %11 : vector<8xf32> to vector<8x1xf32>
    %cst_7 = arith.constant 2.560000e+02 : f32
    %13 = vector.broadcast %cst_7 : f32 to vector<8x1xf32>
    %14 = arith.divf %12, %13 : vector<8x1xf32>
    %cst_8 = arith.constant 9.99999974E-6 : f32
    %15 = vector.broadcast %cst_8 : f32 to vector<8x1xf32>
    %16 = arith.addf %14, %15 : vector<8x1xf32>
    %17 = math.rsqrt %16 : vector<8x1xf32>
    %18 = vector.broadcast %17 : vector<8x1xf32> to vector<8x256xf32>
    %19 = arith.mulf %9, %18 : vector<8x256xf32>
    %cst_9 = arith.constant 0.000000e+00 : f32
    %20 = vector.broadcast %cst_9 : f32 to vector<8x256xf32>
    %21 = arith.cmpf oge, %19, %20 : vector<8x256xf32>
    %cst_10 = arith.constant 2.000000e-01 : f32
    %22 = vector.broadcast %cst_10 : f32 to vector<8x256xf32>
    %23 = arith.mulf %22, %19 : vector<8x256xf32>
    %24 = arith.select %21, %19, %23 : vector<8x256xi1>, vector<8x256xf32>
    %c0_11 = arith.constant 0 : index
    %c0_12 = arith.constant 0 : index
    %c0_13 = arith.constant 0 : index
    %25 = vector.load %arg3[%c0_11, %c0_12, %c0_13] : memref<1x8x256xf32, #tpu.memory_space<vmem>>, vector<1x8x256xf32>
    %26 = vector.shape_cast %25 : vector<1x8x256xf32> to vector<8x256xf32>
    %27 = vector.shape_cast %24 : vector<8x256xf32> to vector<1x8x256xf32>
    tpu.vector_store %arg3[%c0_11, %c0_12, %c0_13], %27 {strides = array<i32>} : memref<1x8x256xf32, #tpu.memory_space<vmem>>, vector<1x8x256xf32>,
    return
  }
  func.func @transform_0(%arg0: i32) -> (i32, i32, i32) {
    %c0_i32 = arith.constant 0 : i32
    %c0_i32_0 = arith.constant 0 : i32
    %c0_i32_1 = arith.constant 0 : i32
    return %arg0, %c0_i32, %c0_i32_0 : i32, i32, i32
  }
  func.func @transform_1(%arg0: i32) -> (i32, i32) {
    %c0_i32 = arith.constant 0 : i32
    %c0_i32_0 = arith.constant 0 : i32
    %c0_i32_1 = arith.constant 0 : i32
    return %c0_i32, %c0_i32_0 : i32, i32
  }
  func.func @transform_2(%arg0: i32) -> (i32, i32, i32) {
    %c0_i32 = arith.constant 0 : i32
    %c0_i32_0 = arith.constant 0 : i32
    %c0_i32_1 = arith.constant 0 : i32
    return %arg0, %c0_i32, %c0_i32_0 : i32, i32, i32
  }
}

</mosaic_0001>

<bundles_post_ra>
// kernel: tpu_custom_call.1
= control target key start
LH: loop header
LB: loop body
LE: loop exit
PB: predicated region body
PF: predicated region fallthrough
CT: control target
= control target key end

     0   :  { %7 = vsyncpa [#allocation3], 0  ;;  %s580_s0 = inlined_call_operand.vmem [shape: bf16[2,36,256], index: 0, kind: input, shape index: {}]   ;;  %s581_s1 = inlined_call_operand.vmem [shape: bf16[8,36], index: 1, kind: input, shape index: {}]   ;;  %s582_s2 = inlined_call_operand.hbm [shape: f32[2,8,256], index: 2, kind: output, shape index: {}]  }
   0x1   :  { %9 = vsyncpa [#allocation3 + $0x1], 0  ;;  %s477_s9 = smov 0   ;;  %s479_s10 = smov 0  }
   0x2   :  { %s481_s11 = smov 0   ;;  %s483_s12 = smov 0  }
   0x3 LB: > { %s498_s13 = sadd.s32 4294967295, %s458_s12   ;;  %s325_s14 = sadd.s32 4294967294, %s458_s12   ;;  %s458_s12 = sphi %s483_s12, %s588_s12   ;;  %s454_s11 = sphi %s481_s11, %s587_s11   ;;  %s450_s10 = sphi %s479_s10, %s586_s10   ;;  %s446_s9 = sphi %s477_s9, %s585_s9  }
   0x4   : > { %s502_s15 = sadd.s32 1, %s458_s12   ;;  %s69_s16 = sadd.s32 1, %s454_s11 }
   0x5   : > { %s66_s17 = ssub.s32 %s458_s12, %s502_s15  ;;  %p79_p0 = scmp.ne.s32.totalorder %s454_s11, %s450_s10 }
   0x6   : > { %p67_p1 = scmp.eq.s32.totalorder %s66_s17, 0  ;;  %p80_p2 = scmp.eq.s32.totalorder %s498_s13, 1 }
   0x7   : > { %p85_p3 = scmp.ne.s32.totalorder %s450_s10, %s446_s9  ;;  %p86_p4 = scmp.eq.s32.totalorder %s325_s14, 1 }
   0x8   : > { %s513_s18 = scalar_select %p67_p1, %s454_s11, %s69_s16  }
   0x9   : > { %p515_p5 = por %p80_p2, %p79_p0  ;;  %p519_p6 = por %p86_p4, %p85_p3 }
   0xa   : > { %p328_p7 = scmp.ge.s32.totalorder %s458_s12, 1  ;;  %p115_p8 = scmp.lt.s32.totalorder %s458_s12, 3 }
   0xc   : > { %p116_p9 = pnand %p328_p7, %p115_p8 }
   0xd   : > { %p137_p10 = scmp.lt.s32.totalorder (!%p116_p9), %s498_s13, 1  ;;  %v460_v0 = vmov (!%p116_p9), 0   ;;  %vm178_vm0 = vcmask (!%p116_p9), 1041408   ;;  %v143_v9 = vld [vmem:[%s581_s1] sm:$0xf] (!%p116_p9)  ;;  %vm174_vm1 = vcmask (!%p116_p9), 293888  }
   0xe   : > { %119 = sbr.rel (%p116_p9) target bundleno = 580 (0x244), region = 28  ;;  %217 = vmatprep.mubr.bf16.mxu0 (!%p116_p9), %v460_v0  ;;  %s134_s28 = sand.u32 (!%p116_p9), 1, %s450_s10  }
   0xf   : > { %s329_s29 = sshll.u32 (!%p116_p9), %s134_s28, 4  ;;  %s344_s30 = sshll.u32 (!%p116_p9), %s498_s13, 8 }
  0x10   : > { %s136_s3 = scalar_lea.vmem (!%p116_p9), [#allocation2], %s329_s29  ;;  %s538_s7 = scalar_lea.hbm (!%p116_p9), %s582_s2, %s344_s30 }
  0x11   : > { %s266_s4 = sshll.u32 (!%p116_p9), %s136_s3, 4  ;;  %s252_s8 = scalar_lea.sflag (!%p116_p9), [#allocation3], %s134_s28  ;;  %s540_s4 = int_to_ptr.vmem [resolvable:$true] %s266_s4 }
  0x12   : > { %s461_s14 = smov (!%p116_p9), [#allocation2]  }
  0x13   : > { %s400_s16 = sshll.u32 (!%p116_p9), %s461_s14, 4  ;;  %s401_s16 = int_to_ptr.vmem [resolvable:$false] %s400_s16 }
  0x14   : > { %s402_s17 = scalar_lea.vmem (!%p116_p9), %s401_s16, 512  ;;  %p403_p0 = scmp.lt.s32.totalorder (!%p116_p9), %s540_s4, %s401_s16 }
  0x15   : > { %s138_s21 = scalar_select %p137_p10, %s498_s13, 1 }
  0x16   : > { %s396_s13 = scalar_lea.vmem %s540_s4, 256 }
  0x17   : > { %s345_s22 = smul.u32 40, %s138_s21  ;;  %p397_p11 = scmp.ne.s32.totalorder %s540_s4, %s396_s13 }
  0x18   : > { %p404_p1 = scmp.lt.s32.totalorder %s402_s17, %s396_s13 }
  0x19   : > { %s141_s25 = scalar_lea.vmem %s580_s0, %s345_s22  ;;  %p398_p12 = pnand %p397_p11, %p515_p5 }
  0x1a   : > { %v386_v1 = vld [vmem:[%s141_s25 + $0x4] ss:$8 sps:$4 sm:$0xff]   ;;  %v388_v2 = vld [vmem:[%s141_s25] ss:$8 sps:$4 sm:$0xff]   ;;  %v389_v3 = vld [vmem:[%s141_s25 + $0x14] ss:$8 sps:$4 sm:$0xff]   ;;  %p405_p2 = por %p404_p1, %p403_p0 }
  0x1b   : > { %185 = vmatprep.subr.bf16.mxu0 %v386_v1  ;;  %v148_v4 = vld [vmem:[%s141_s25 + $0x20] sm:$0x33]  ;;  %v391_v5 = vld [vmem:[%s141_s25 + $0x10] ss:$8 sps:$4 sm:$0xff]   ;;  %p399_p13 = pneg %p398_p12 }
  0x1c   : > { %186 = vmatpush1.bf16.msra.mxu0 %v388_v2  ;;  %v336_v6 = vcombine.high %v148_v4, %v148_v4  ;;  %v335_v7 = vcombine.low %v148_v4, %v148_v4 }
  0x1d   : > { %187 = vmatprep.subr.bf16.mxu0 %v389_v3  ;;  %p406_p3 = pnand %p405_p2, %p399_p13 }
  0x1e   : > { %v180_v8 = vsel %vm178_vm0, %v335_v7, 0 }
  0x20   : > { %188 = vmatpush1.bf16.msra.mxu0 %v391_v5 }
  0x21   : > { %337 = vmatprep.subr.msk.bf16.mxu0 %vm178_vm0, %v336_v6 }
  0x24   : > { %190 = vmatpush1.bf16.msra.mxu0 %v180_v8 }
  0x27   : > { %338 = vmatmul.mubr.msk.bf16.vlgmr.msra.gmra.mrb[0].mxu0 %vm174_vm1, %v143_v9 }
  0xfa   : > { %v219_v10 = vpop.f32.mrb[0].mxu0 }
  0xfb   : > { %v221_v11 = vpop.f32.mrb[1].mxu0 }
  0xfc   : > { %v223_v12 = vpop.f32.mrb[2].mxu0  ;;  %v226_v13 = vadd.f32 %v221_v11, %v219_v10 }
  0xfd   : > { %v224_v14 = vpop.f32.mrb[3].mxu0 }
  0xfe   : > { %227 = vadd.xlane.f32.xlu0 %v226_v13 }
 0x18b   : > { %v228_v15 = vpop.xlane.xlu0 %227 }
 0x18c   : > { %v230_v16 = vmul.f32 0.00390625, %v228_v15 }
 0x18e   : > { %v231_v17 = vsub.f32 %v219_v10, %v230_v16  ;;  %v232_v18 = vsub.f32 %v221_v11, %v230_v16 }
 0x190   : > { %v233_v19 = vmul.f32 %v231_v17, %v231_v17  ;;  %v234_v20 = vmul.f32 %v232_v18, %v232_v18 }
 0x192   : > { %v235_v21 = vadd.f32 %v234_v20, %v233_v19 }
 0x194   : > { %236 = vadd.xlane.f32.xlu0 %v235_v21 }
 0x221   : > { %v237_v22 = vpop.xlane.xlu0 %236 }
 0x222   : > { %v238_v23 = vmul.f32 0.00390625, %v237_v22 }
 0x224   : > { %v239_v24 = vadd.f32 1e-05, %v238_v23 }
 0x226   : > { %394 = vrsqrt.f32 %v239_v24 }
 0x230   : > { %v395_v25 = vpop.eup %394 }
 0x231   : > { %v241_v26 = vmul.f32 %v395_v25, %v231_v17  ;;  %v242_v27 = vmul.f32 %v395_v25, %v232_v18 }
 0x233   : > { %vm243_vm2 = vcmp.ge.f32.partialorder %v241_v26, 0.0  ;;  %vm244_vm3 = vcmp.ge.f32.partialorder %v242_v27, 0.0  ;;  %v245_v28 = vmul.f32 0.2, %v241_v26  ;;  %v246_v29 = vmul.f32 0.2, %v242_v27 }
 0x235   : > { %v247_v30 = vsel %vm243_vm2, %v241_v26, %v245_v28  ;;  %v248_v31 = vsel %vm244_vm3, %v242_v27, %v246_v29 }
 0x236   : > { %249 = vst [vmem:[%s136_s3] sm:$0xff] %v247_v30  ;;  %250 = vst [vmem:[%s136_s3 + $0x8] sm:$0xff] %v248_v31 }
 0x237   : > { %409 = shalt.err (!%p406_p3)
}
 0x238   : > { %s410_s21 = scalar_lea.hbm %s538_s7, 256  ;;  %s414_s24 = scalar_lea.hbm %s582_s2, 512 }
 0x239   : > { %p411_p4 = scmp.ne.s32.totalorder %s538_s7, %s410_s21  ;;  %p415_p9 = scmp.lt.u32.totalorder %s538_s7, %s582_s2 }
 0x23a   : > { %p416_p10 = scmp.lt.u32.totalorder %s414_s24, %s410_s21  ;;  %p418_p12 = scmp.lt.u32.totalorder %s410_s21, %s538_s7 }
 0x23b   : > { %p412_p7 = pnand %p411_p4, %p515_p5 }
 0x23c   : > { %p417_p11 = por %p416_p10, %p415_p9 }
 0x23d   : > { %p413_p8 = pneg %p412_p7 }
 0x23e   : > { %p419_p13 = por %p418_p12, %p417_p11 }
 0x240   : > { %p420_p0 = pnand %p419_p13, %p413_p8 }
 0x242   : > { %423 = shalt.err (!%p420_p0)
}
 0x243   : > { %346 = dma.vmem_to_hbm [thread:$0]  (%p515_p5), %s540_s4, 256, %s538_s7, %s252_s8  }
 0x244 PF: > { %p352_p1 = scmp.ge.s32.totalorder %s458_s12, 2  ;;  %s278_s27 = sand.u32 1, %s446_s9  }
 0x245   : > { %s279_s28 = scalar_lea.sflag [#allocation3], %s278_s27 }
 0x246   : > { %p349_p2 = pnand %p352_p1, %p519_p6 }
 0x248   : > { %441 = dma.done.wait (!%p349_p2), %s279_s28, 256  }
 0x249   : > { %443 = vsyncadd (!%p349_p2), %s279_s28, 4294967040  ;;  %p12_p3 = scmp.ge.s32.totalorder %s502_s15, 4   ;;  %s585_s9 = smov %s450_s10 }
 0x24a   : > { %s586_s10 = smov %s454_s11  ;;  %s587_s11 = smov %s513_s18 }
 0x24b   : > { %s588_s12 = smov %s502_s15  ;;  %14 = sbr.rel (!%p12_p3) target bundleno = 3 (0x3), region = 63 }
 0x252   :  { %284 = vsyncpa [#allocation3], 1 }
 0x253   :  { %286 = vsyncpa [#allocation3 + $0x1], 1 }

</bundles_post_ra>
